<compile_context>
chip_gen: v6e
topology: v6e:2x2x1
jax: 0.10.0
libtpu: 0.0.40
codegen_flags: <defaults>
</compile_context>

<pallas_src>
import functools

import jax
import jax.numpy as jnp
import numpy as np
from jax.experimental import pallas as pl
from jax.experimental.pallas import tpu as pltpu

# Static loss weights (WeightedSum.__init__ default: 1.0 per key).
W_INFECTIOUSNESS = 1.0
W_CONTAGION = 1.0

# Tiling / VMEM budget knobs.
_TN_CAP = 2048                           # max seq-tile width (lanes)
_TB_CAP = 256                            # max batch-tile height (sublanes)
_VMEM_INPUT_BUDGET = 24 * 1024 * 1024    # budget for double-buffered input tiles
_VMEM_LIMIT_BYTES = 48 * 1024 * 1024     # scoped-VMEM limit (< v7x 64 MiB physical)


def _cdiv(a, b):
    return -(-a // b)


def _round_down(x, m):
    return (x // m) * m


def _fused_masked_loss_kernel(
        inf_p_ref, inf_t_ref, inf_m_ref,
        con_p_ref, con_t_ref, con_m_ref,
        inf_num_ref, inf_den_ref, con_num_ref, con_den_ref,
        *, seq_lens, tile_ns, n_seq_blocks):
    """One (tb, tn) step of both EntityMaskedLoss reductions.

    Grid = (batch_tiles ["parallel"], seq_tiles ["arbitrary", last]).
    The four (tb, 1) outputs are revisited across the seq axis and act as
    lane-thin accumulators; the per-step XLU reduce is hidden under HBM stalls.
    """
    s = pl.program_id(1)

    @pl.when(s == 0)
    def _():
        inf_num_ref[...] = jnp.zeros_like(inf_num_ref)
        inf_den_ref[...] = jnp.zeros_like(inf_den_ref)
        con_num_ref[...] = jnp.zeros_like(con_num_ref)
        con_den_ref[...] = jnp.zeros_like(con_den_ref)

    def accumulate(p_ref, t_ref, m_ref, num_ref, den_ref, seq_len, tn, loss_type):
        def body():
            p = p_ref[...].astype(jnp.float32)
            t = t_ref[...].astype(jnp.float32)
            m = m_ref[...].astype(jnp.float32)
            if loss_type == "mse":
                d = p - t
                el = d * d
            else:  # "bce_logits": numerically stable, same formula as PyTorch.
                el = jnp.maximum(p, 0.0) - p * t + jnp.log1p(jnp.exp(-jnp.abs(p)))
            num = el * m
            den = m
            if seq_len % tn != 0:
                # Ragged last seq tile: lanes past seq_len hold uninitialized
                # data; zero their contribution (no wrapper-side padding).
                col = jax.lax.broadcasted_iota(jnp.int32, p.shape, 1)
                valid = (s * tn + col) < seq_len
                num = jnp.where(valid, num, 0.0)
                den = jnp.where(valid, den, 0.0)
            # Per-step cross-lane reduce into the (tb, 1) output accumulators.
            num_ref[...] += jnp.sum(num, axis=-1, keepdims=True)
            den_ref[...] += jnp.sum(den, axis=-1, keepdims=True)

        nb = _cdiv(seq_len, tn)
        if nb == n_seq_blocks:
            body()                    # this stream spans the whole seq grid axis
        else:
            pl.when(s < nb)(body)     # shorter stream: skip trailing grid steps

    accumulate(inf_p_ref, inf_t_ref, inf_m_ref, inf_num_ref, inf_den_ref,
               seq_lens[0], tile_ns[0], "mse")
    accumulate(con_p_ref, con_t_ref, con_m_ref, con_num_ref, con_den_ref,
               seq_lens[1], tile_ns[1], "bce_logits")


def _pick_tn(n):
    # Full extent (block == full dim: always legal, no ragged tail) when it fits
    # the cap; otherwise 128-aligned tiles with an iota-masked ragged last tile.
    return n if n <= _TN_CAP else _TN_CAP


def _pick_tb(B, row_bytes):
    if B <= 8:
        return B                      # block == full batch dim: always legal
    tb_budget = max(8, _round_down(_VMEM_INPUT_BUDGET // (2 * row_bytes), 8))
    tb = min(_TB_CAP, _round_down(B, 8), tb_budget)
    if _cdiv(B, tb) < 2:
        # Keep >= 2 batch tiles so the "parallel" axis can split across v7x's 2 TCs.
        tb = max(8, _round_down(B // 2, 8))
    return tb


def _fused_masked_loss_rows(inf_p, inf_t, inf_m, con_p, con_t, con_m):
    """Per-batch-row loss numerators / mask counts for both losses in one call.

    inf_* : (B, T) streams for the masked-MSE (infectiousness) loss.
    con_* : (B, M) streams for the masked-BCE-with-logits (contagion) loss.
    Returns four f32 (B,) arrays: inf_num, inf_den, con_num, con_den.
    """
    B, T = inf_p.shape
    _, M = con_p.shape

    tn_inf = _pick_tn(T)
    tn_con = _pick_tn(M)
    streams = ((inf_p, tn_inf), (inf_t, tn_inf), (inf_m, tn_inf),
               (con_p, tn_con), (con_t, tn_con), (con_m, tn_con))
    row_bytes = sum(x.dtype.itemsize * tn for x, tn in streams)
    tb = _pick_tb(B, row_bytes)

    n_inf = _cdiv(T, tn_inf)
    n_con = _cdiv(M, tn_con)
    n_seq = max(n_inf, n_con)
    grid = (_cdiv(B, tb), n_seq)

    def seq_spec(tn, nb):
        if nb == n_seq:
            return pl.BlockSpec((tb, tn), lambda b, s: (b, s))
        last = nb - 1
        # Clamp so the DMA never reads past the shorter stream; Pallas skips the
        # copy when the block index repeats, and the kernel skips the compute.
        return pl.BlockSpec((tb, tn), lambda b, s: (b, jnp.minimum(s, last)))

    in_specs = [seq_spec(tn_inf, n_inf)] * 3 + [seq_spec(tn_con, n_con)] * 3
    out_spec = pl.BlockSpec((tb, 1), lambda b, s: (b, 0))
    out_shape = tuple(jax.ShapeDtypeStruct((B, 1), jnp.float32) for _ in range(4))

    n_inf_el = B * T
    n_con_el = B * M
    cost = pl.CostEstimate(
        flops=5 * n_inf_el + 10 * n_con_el,
        transcendentals=2 * n_con_el,
        bytes_accessed=int(sum(x.size * x.dtype.itemsize for x, _ in streams)
                           + 4 * B * 4))

    kernel = functools.partial(
        _fused_masked_loss_kernel,
        seq_lens=(T, M), tile_ns=(tn_inf, tn_con), n_seq_blocks=n_seq)

    inf_num, inf_den, con_num, con_den = pl.pallas_call(
        kernel,
        out_shape=out_shape,
        grid_spec=pltpu.PrefetchScalarGridSpec(
            num_scalar_prefetch=0,
            grid=grid,
            in_specs=in_specs,
            out_specs=(out_spec,) * 4),
        compiler_params=pltpu.CompilerParams(
            dimension_semantics=("parallel", "arbitrary"),
            vmem_limit_bytes=_VMEM_LIMIT_BYTES,
            allow_input_fusion=[True] * 6),
        cost_estimate=cost,
    )(inf_p, inf_t, inf_m, con_p, con_t, con_m)

    return inf_num[:, 0], inf_den[:, 0], con_num[:, 0], con_den[:, 0]


def _as_mask_input(x):
    # bool -> int8 (cheap, 1 byte/elem) so the mask stream lowers cleanly;
    # f32 / bf16 / int8 masks pass through untouched -- no wrapper-side copies.
    return x.astype(jnp.int8) if x.dtype == jnp.bool_ else x


def weighted_sum_loss(latent_variable, infectiousness_history, valid_history_mask,
                      encounter_variables, encounter_is_contagion, mask):
    """JAX wrapper mirroring WeightedSum.forward (default weights = 1.0).

    latent_variable:          (B, T, C)  model_output.latent_variable
    infectiousness_history:   (B, T, 1)  model_input.infectiousness_history
    valid_history_mask:       (B, T)     model_input['valid_history_mask']
    encounter_variables:      (B, M, C)  model_output.encounter_variables
    encounter_is_contagion:   (B, M, 1)  model_input.encounter_is_contagion
    mask:                     (B, M)     model_input.mask
    """
    # Channel-0 selection of the (B, N, C) prediction tensors. With
    # allow_input_fusion, XLA may fuse these slices straight into the
    # pallas-call operands instead of materializing an extra (B, N) HBM copy.
    inf_pred = latent_variable[:, :, 0]
    inf_tgt = infectiousness_history[:, :, 0]
    con_logit = encounter_variables[:, :, 0]
    con_tgt = encounter_is_contagion[:, :, 0]

    inf_num, inf_den, con_num, con_den = _fused_masked_loss_rows(
        inf_pred, inf_tgt, _as_mask_input(valid_history_mask),
        con_logit, con_tgt, _as_mask_input(mask))

    # Tiny finalize in plain JAX: per-row normalize, batch mean, weighted sum.
    # (Division matches PyTorch semantics: fully-masked rows yield nan/inf.)
    inf_loss = jnp.mean(inf_num / inf_den)
    con_loss = jnp.mean(con_num / con_den)

    unweighted = {"infectiousness": inf_loss, "contagion": con_loss}
    weighted = {"infectiousness": W_INFECTIOUSNESS * inf_loss,
                "contagion": W_CONTAGION * con_loss}
    total = weighted["infectiousness"] + weighted["contagion"]
    return {"unweighted_losses": unweighted,
            "weighted_losses": weighted,
            "loss": total}


def _reference(latent, inf_hist, vmask, enc_vars, enc_contagion, mask):
    # Pure-JAX reference of the PyTorch semantics, for verification.
    p = latent[:, :, 0].astype(jnp.float32)
    t = inf_hist[:, :, 0].astype(jnp.float32)
    m = vmask.astype(jnp.float32)
    inf = jnp.mean(jnp.sum((p - t) ** 2 * m, -1) / jnp.sum(m, -1))

    x = enc_vars[:, :, 0].astype(jnp.float32)
    z = enc_contagion[:, :, 0].astype(jnp.float32)
    cm = mask.astype(jnp.float32)
    bce = jnp.maximum(x, 0.0) - x * z + jnp.log1p(jnp.exp(-jnp.abs(x)))
    con = jnp.mean(jnp.sum(bce * cm, -1) / jnp.sum(cm, -1))
    return inf, con, W_INFECTIOUSNESS * inf + W_CONTAGION * con


def _run_case(key, B, T, M, C, fn):
    k1, k2, k3, k4, k5, k6 = jax.random.split(key, 6)
    latent_variable = jax.random.normal(k1, (B, T, C), dtype=jnp.float32)
    infectiousness_history = jax.random.normal(k2, (B, T, 1), dtype=jnp.float32)
    valid_history_mask = (jax.random.uniform(k3, (B, T)) > 0.3).astype(jnp.float32)
    valid_history_mask = valid_history_mask.at[:, 0].set(1.0)  # avoid /0

    encounter_variables = jax.random.normal(k4, (B, M, C), dtype=jnp.float32)
    encounter_is_contagion = (jax.random.uniform(k5, (B, M, 1)) > 0.7).astype(jnp.float32)
    mask = (jax.random.uniform(k6, (B, M)) > 0.3).astype(jnp.float32)
    mask = mask.at[:, 0].set(1.0)  # avoid /0

    out = fn(latent_variable, infectiousness_history, valid_history_mask,
             encounter_variables, encounter_is_contagion, mask)
    jax.block_until_ready(out["loss"])

    ref_inf, ref_con, ref_total = _reference(latent_variable,
                                             infectiousness_history,
                                             valid_history_mask,
                                             encounter_variables,
                                             encounter_is_contagion, mask)
    np.testing.assert_allclose(np.array(out["unweighted_losses"]["infectiousness"]),
                               np.array(ref_inf), rtol=1e-5, atol=1e-5)
    np.testing.assert_allclose(np.array(out["unweighted_losses"]["contagion"]),
                               np.array(ref_con), rtol=1e-5, atol=1e-5)
    np.testing.assert_allclose(np.array(out["loss"]),
                               np.array(ref_total), rtol=1e-5, atol=1e-5)


if __name__ == "__main__":
    fn = jax.jit(weighted_sum_loss)
    key = jax.random.PRNGKey(0)
    k_a, k_b = jax.random.split(key)

    # Small case: B <= 8 (single full-B batch tile), full-extent seq tiles.
    _run_case(k_a, B=4, T=16, M=8, C=3, fn=fn)
    # Ragged-batch case: B=9 -> tb=8, partial second batch tile (discarded rows).
    _run_case(k_b, B=9, T=40, M=24, C=3, fn=fn)

    print("KERNEL_OK")
</pallas_src>

<mosaic_0001>
module attributes {stable_mosaic.version = 11 : i64} {
  func.func @_fused_masked_loss_kernel(%arg0: i32, %arg1: i32, %arg2: memref<4x16xf32, #tpu.memory_space<vmem>>, %arg3: memref<4x16xf32, #tpu.memory_space<vmem>>, %arg4: memref<4x16xf32, #tpu.memory_space<vmem>>, %arg5: memref<4x8xf32, #tpu.memory_space<vmem>>, %arg6: memref<4x8xf32, #tpu.memory_space<vmem>>, %arg7: memref<4x8xf32, #tpu.memory_space<vmem>>, %arg8: memref<4x1xf32, #tpu.memory_space<vmem>>, %arg9: memref<4x1xf32, #tpu.memory_space<vmem>>, %arg10: memref<4x1xf32, #tpu.memory_space<vmem>>, %arg11: memref<4x1xf32, #tpu.memory_space<vmem>>) attributes {dimension_semantics = [#tpu.dimension_semantics<parallel>, #tpu.dimension_semantics<arbitrary>], iteration_bounds = array<i64: 1, 1>, scalar_prefetch = 0 : i64, scratch_operands = 0 : i64, tpu.core_type = #tpu.core_type<tc>, window_params = [{transform_indices = @transform_0, window_bounds = array<i64: 4, 16>}, {transform_indices = @transform_1, window_bounds = array<i64: 4, 16>}, {transform_indices = @transform_2, window_bounds = array<i64: 4, 16>}, {transform_indices = @transform_3, window_bounds = array<i64: 4, 8>}, {transform_indices = @transform_4, window_bounds = array<i64: 4, 8>}, {transform_indices = @transform_5, window_bounds = array<i64: 4, 8>}, {transform_indices = @transform_6, window_bounds = array<i64: 4, 1>}, {transform_indices = @transform_7, window_bounds = array<i64: 4, 1>}, {transform_indices = @transform_8, window_bounds = array<i64: 4, 1>}, {transform_indices = @transform_9, window_bounds = array<i64: 4, 1>}]} {
    %c0_i32 = arith.constant 0 : i32
    %0 = arith.cmpi eq, %arg1, %c0_i32 : i32
    %1 = arith.extui %0 : i1 to i32
    %c0_i32_0 = arith.constant 0 : i32
    %2 = arith.cmpi ne, %1, %c0_i32_0 : i32
    scf.if %2 {
      %cst_33 = arith.constant 0.000000e+00 : f32
      %43 = vector.broadcast %cst_33 : f32 to vector<4x1xf32>
      %c0_34 = arith.constant 0 : index
      %c0_35 = arith.constant 0 : index
      %44 = vector.load %arg8[%c0_34, %c0_35] : memref<4x1xf32, #tpu.memory_space<vmem>>, vector<4x1xf32>
      tpu.vector_store %arg8[%c0_34, %c0_35], %43 {strides = array<i32>} : memref<4x1xf32, #tpu.memory_space<vmem>>, vector<4x1xf32>,
      %cst_36 = arith.constant 0.000000e+00 : f32
      %45 = vector.broadcast %cst_36 : f32 to vector<4x1xf32>
      %c0_37 = arith.constant 0 : index
      %c0_38 = arith.constant 0 : index
      %46 = vector.load %arg9[%c0_37, %c0_38] : memref<4x1xf32, #tpu.memory_space<vmem>>, vector<4x1xf32>
      tpu.vector_store %arg9[%c0_37, %c0_38], %45 {strides = array<i32>} : memref<4x1xf32, #tpu.memory_space<vmem>>, vector<4x1xf32>,
      %cst_39 = arith.constant 0.000000e+00 : f32
      %47 = vector.broadcast %cst_39 : f32 to vector<4x1xf32>
      %c0_40 = arith.constant 0 : index
      %c0_41 = arith.constant 0 : index
      %48 = vector.load %arg10[%c0_40, %c0_41] : memref<4x1xf32, #tpu.memory_space<vmem>>, vector<4x1xf32>
      tpu.vector_store %arg10[%c0_40, %c0_41], %47 {strides = array<i32>} : memref<4x1xf32, #tpu.memory_space<vmem>>, vector<4x1xf32>,
      %cst_42 = arith.constant 0.000000e+00 : f32
      %49 = vector.broadcast %cst_42 : f32 to vector<4x1xf32>
      %c0_43 = arith.constant 0 : index
      %c0_44 = arith.constant 0 : index
      %50 = vector.load %arg11[%c0_43, %c0_44] : memref<4x1xf32, #tpu.memory_space<vmem>>, vector<4x1xf32>
      tpu.vector_store %arg11[%c0_43, %c0_44], %49 {strides = array<i32>} : memref<4x1xf32, #tpu.memory_space<vmem>>, vector<4x1xf32>,
    } else {
    }
    %c0 = arith.constant 0 : index
    %c0_1 = arith.constant 0 : index
    %3 = vector.load %arg2[%c0, %c0_1] : memref<4x16xf32, #tpu.memory_space<vmem>>, vector<4x16xf32>
    %c0_2 = arith.constant 0 : index
    %c0_3 = arith.constant 0 : index
    %4 = vector.load %arg3[%c0_2, %c0_3] : memref<4x16xf32, #tpu.memory_space<vmem>>, vector<4x16xf32>
    %c0_4 = arith.constant 0 : index
    %c0_5 = arith.constant 0 : index
    %5 = vector.load %arg4[%c0_4, %c0_5] : memref<4x16xf32, #tpu.memory_space<vmem>>, vector<4x16xf32>
    %6 = arith.subf %3, %4 : vector<4x16xf32>
    %7 = arith.mulf %6, %6 : vector<4x16xf32>
    %8 = arith.mulf %7, %5 : vector<4x16xf32>
    %c0_6 = arith.constant 0 : index
    %c0_7 = arith.constant 0 : index
    %9 = vector.load %arg8[%c0_6, %c0_7] : memref<4x1xf32, #tpu.memory_space<vmem>>, vector<4x1xf32>
    %cst = arith.constant dense<0.000000e+00> : vector<4xf32>
    %10 = vector.multi_reduction <add>, %8, %cst [1] : vector<4x16xf32> to vector<4xf32>
    %11 = vector.shape_cast %10 : vector<4xf32> to vector<4x1xf32>
    %12 = arith.addf %9, %11 : vector<4x1xf32>
    %c0_8 = arith.constant 0 : index
    %c0_9 = arith.constant 0 : index
    %13 = vector.load %arg8[%c0_8, %c0_9] : memref<4x1xf32, #tpu.memory_space<vmem>>, vector<4x1xf32>
    tpu.vector_store %arg8[%c0_8, %c0_9], %12 {strides = array<i32>} : memref<4x1xf32, #tpu.memory_space<vmem>>, vector<4x1xf32>,
    %c0_10 = arith.constant 0 : index
    %c0_11 = arith.constant 0 : index
    %14 = vector.load %arg9[%c0_10, %c0_11] : memref<4x1xf32, #tpu.memory_space<vmem>>, vector<4x1xf32>
    %cst_12 = arith.constant dense<0.000000e+00> : vector<4xf32>
    %15 = vector.multi_reduction <add>, %5, %cst_12 [1] : vector<4x16xf32> to vector<4xf32>
    %16 = vector.shape_cast %15 : vector<4xf32> to vector<4x1xf32>
    %17 = arith.addf %14, %16 : vector<4x1xf32>
    %c0_13 = arith.constant 0 : index
    %c0_14 = arith.constant 0 : index
    %18 = vector.load %arg9[%c0_13, %c0_14] : memref<4x1xf32, #tpu.memory_space<vmem>>, vector<4x1xf32>
    tpu.vector_store %arg9[%c0_13, %c0_14], %17 {strides = array<i32>} : memref<4x1xf32, #tpu.memory_space<vmem>>, vector<4x1xf32>,
    %c0_15 = arith.constant 0 : index
    %c0_16 = arith.constant 0 : index
    %19 = vector.load %arg5[%c0_15, %c0_16] : memref<4x8xf32, #tpu.memory_space<vmem>>, vector<4x8xf32>
    %c0_17 = arith.constant 0 : index
    %c0_18 = arith.constant 0 : index
    %20 = vector.load %arg6[%c0_17, %c0_18] : memref<4x8xf32, #tpu.memory_space<vmem>>, vector<4x8xf32>
    %c0_19 = arith.constant 0 : index
    %c0_20 = arith.constant 0 : index
    %21 = vector.load %arg7[%c0_19, %c0_20] : memref<4x8xf32, #tpu.memory_space<vmem>>, vector<4x8xf32>
    %cst_21 = arith.constant 0.000000e+00 : f32
    %22 = vector.broadcast %cst_21 : f32 to vector<4x8xf32>
    %23 = arith.maximumf %19, %22 : vector<4x8xf32>
    %24 = arith.mulf %19, %20 : vector<4x8xf32>
    %25 = arith.subf %23, %24 : vector<4x8xf32>
    %26 = math.absf %19 : vector<4x8xf32>
    %cst_22 = arith.constant 0.000000e+00 : f32
    %27 = vector.broadcast %cst_22 : f32 to vector<4x8xf32>
    %28 = arith.subf %27, %26 : vector<4x8xf32>
    %29 = math.exp %28 : vector<4x8xf32>
    %30 = math.log1p %29 : vector<4x8xf32>
    %31 = arith.addf %25, %30 : vector<4x8xf32>
    %32 = arith.mulf %31, %21 : vector<4x8xf32>
    %c0_23 = arith.constant 0 : index
    %c0_24 = arith.constant 0 : index
    %33 = vector.load %arg10[%c0_23, %c0_24] : memref<4x1xf32, #tpu.memory_space<vmem>>, vector<4x1xf32>
    %cst_25 = arith.constant dense<0.000000e+00> : vector<4xf32>
    %34 = vector.multi_reduction <add>, %32, %cst_25 [1] : vector<4x8xf32> to vector<4xf32>
    %35 = vector.shape_cast %34 : vector<4xf32> to vector<4x1xf32>
    %36 = arith.addf %33, %35 : vector<4x1xf32>
    %c0_26 = arith.constant 0 : index
    %c0_27 = arith.constant 0 : index
    %37 = vector.load %arg10[%c0_26, %c0_27] : memref<4x1xf32, #tpu.memory_space<vmem>>, vector<4x1xf32>
    tpu.vector_store %arg10[%c0_26, %c0_27], %36 {strides = array<i32>} : memref<4x1xf32, #tpu.memory_space<vmem>>, vector<4x1xf32>,
    %c0_28 = arith.constant 0 : index
    %c0_29 = arith.constant 0 : index
    %38 = vector.load %arg11[%c0_28, %c0_29] : memref<4x1xf32, #tpu.memory_space<vmem>>, vector<4x1xf32>
    %cst_30 = arith.constant dense<0.000000e+00> : vector<4xf32>
    %39 = vector.multi_reduction <add>, %21, %cst_30 [1] : vector<4x8xf32> to vector<4xf32>
    %40 = vector.shape_cast %39 : vector<4xf32> to vector<4x1xf32>
    %41 = arith.addf %38, %40 : vector<4x1xf32>
    %c0_31 = arith.constant 0 : index
    %c0_32 = arith.constant 0 : index
    %42 = vector.load %arg11[%c0_31, %c0_32] : memref<4x1xf32, #tpu.memory_space<vmem>>, vector<4x1xf32>
    tpu.vector_store %arg11[%c0_31, %c0_32], %41 {strides = array<i32>} : memref<4x1xf32, #tpu.memory_space<vmem>>, vector<4x1xf32>,
    return
  }
  func.func @transform_0(%arg0: i32, %arg1: i32) -> (i32, i32) {
    %c0_i32 = arith.constant 0 : i32
    return %arg0, %arg1 : i32, i32
  }
  func.func @transform_1(%arg0: i32, %arg1: i32) -> (i32, i32) {
    %c0_i32 = arith.constant 0 : i32
    return %arg0, %arg1 : i32, i32
  }
  func.func @transform_2(%arg0: i32, %arg1: i32) -> (i32, i32) {
    %c0_i32 = arith.constant 0 : i32
    return %arg0, %arg1 : i32, i32
  }
  func.func @transform_3(%arg0: i32, %arg1: i32) -> (i32, i32) {
    %c0_i32 = arith.constant 0 : i32
    return %arg0, %arg1 : i32, i32
  }
  func.func @transform_4(%arg0: i32, %arg1: i32) -> (i32, i32) {
    %c0_i32 = arith.constant 0 : i32
    return %arg0, %arg1 : i32, i32
  }
  func.func @transform_5(%arg0: i32, %arg1: i32) -> (i32, i32) {
    %c0_i32 = arith.constant 0 : i32
    return %arg0, %arg1 : i32, i32
  }
  func.func @transform_6(%arg0: i32, %arg1: i32) -> (i32, i32) {
    %c0_i32 = arith.constant 0 : i32
    %c0_i32_0 = arith.constant 0 : i32
    return %arg0, %c0_i32 : i32, i32
  }
  func.func @transform_7(%arg0: i32, %arg1: i32) -> (i32, i32) {
    %c0_i32 = arith.constant 0 : i32
    %c0_i32_0 = arith.constant 0 : i32
    return %arg0, %c0_i32 : i32, i32
  }
  func.func @transform_8(%arg0: i32, %arg1: i32) -> (i32, i32) {
    %c0_i32 = arith.constant 0 : i32
    %c0_i32_0 = arith.constant 0 : i32
    return %arg0, %c0_i32 : i32, i32
  }
  func.func @transform_9(%arg0: i32, %arg1: i32) -> (i32, i32) {
    %c0_i32 = arith.constant 0 : i32
    %c0_i32_0 = arith.constant 0 : i32
    return %arg0, %c0_i32 : i32, i32
  }
}

</mosaic_0001>

<bundles_post_ra>
// kernel: weighted_sum_loss.2
= control target key start
LH: loop header
LB: loop body
LE: loop exit
PB: predicated region body
PF: predicated region fallthrough
CT: control target
= control target key end

     0   :  { %15 = vsyncpa [#allocation13], 0  ;;  %s339_s0 = inlined_call_operand.vmem [shape: f32[4,16], index: 0, kind: input, shape index: {}]   ;;  %s340_s1 = inlined_call_operand.hbm [shape: f32[4,16], index: 1, kind: input, shape index: {}]   ;;  %s341_s2 = inlined_call_operand.vmem [shape: f32[4,8], index: 2, kind: input, shape index: {}]   ;;  %s342_s3 = inlined_call_operand.vmem [shape: f32[4,8], index: 3, kind: input, shape index: {}]   ;;  %s343_s4 = inlined_call_operand.hbm [shape: f32[4,8,3], index: 4, kind: input, shape index: {}]   ;;  %s344_s5 = inlined_call_operand.hbm [shape: f32[4,16,3], index: 5, kind: input, shape index: {}]   ;;  %s345_s6 = inlined_call_operand.vmem [shape: f32[4,1], index: 6, kind: output, shape index: {0}]   ;;  %s346_s7 = inlined_call_operand.vmem [shape: f32[4,1], index: 7, kind: output, shape index: {1}]   ;;  %s347_s8 = inlined_call_operand.vmem [shape: f32[4,1], index: 8, kind: output, shape index: {2}]   ;;  %s348_s9 = inlined_call_operand.vmem [shape: f32[4,1], index: 9, kind: output, shape index: {3}]  }
   0x1   :  { %16 = vsyncpa [#allocation15], 0  ;;  %s223_s30 = smov [#allocation14]   ;;  %s224_s11 = smov [#allocation12]  }
   0x2   :  { %s35_s10 = sshll.u32 %s223_s30, 4  ;;  %s23_s12 = sshll.u32 %s224_s11, 4  ;;  %s36_s10 = int_to_ptr.vmem [resolvable:$true] %s35_s10  ;;  %s24_s12 = int_to_ptr.vmem [resolvable:$true] %s23_s12 }
   0x3   :  { %s167_s13 = scalar_lea.vmem %s36_s10, 64  ;;  %p172_p1 = scmp.lt.s32.totalorder %s36_s10, %s36_s10 }
   0x4   :  { %p168_p0 = scmp.ne.s32.totalorder %s36_s10, %s167_s13  ;;  %p173_p2 = scmp.lt.s32.totalorder %s167_s13, %s167_s13 }
   0x6   :  { %p174_p3 = por %p173_p2, %p172_p1 }
   0x8   :  { %p175_p4 = pnand %p174_p3, %p168_p0 }
   0xa   :  { %178 = shalt.err (!%p175_p4)
}
   0xb   :  { %38 = dma.hbm_to_vmem [thread:$0]  %s340_s1, 64, %s36_s10, [#allocation15]  }
   0xc   :  { %s187_s16 = scalar_lea.vmem %s24_s12, 64  ;;  %p192_p6 = scmp.lt.s32.totalorder %s24_s12, %s24_s12 }
   0xd   :  { %p188_p5 = scmp.ne.s32.totalorder %s24_s12, %s187_s16  ;;  %p193_p7 = scmp.lt.s32.totalorder %s187_s16, %s187_s16 }
   0xf   :  { %p194_p8 = por %p193_p7, %p192_p6 }
  0x11   :  { %p195_p9 = pnand %p194_p8, %p188_p5 }
  0x13   :  { %198 = shalt.err (!%p195_p9)
}
  0x14   :  { %26 = dma.hbm_to_vmem [thread:$0]  %s344_s5, 64, %s24_s12, [#allocation13]  }
  0x15   :  { %s225_s19 = smov [#allocation16]  }
  0x16   :  { %s45_s20 = sshll.u32 %s225_s19, 4  ;;  %s46_s20 = int_to_ptr.vmem [resolvable:$true] %s45_s20 }
  0x17   :  { %s207_s21 = scalar_lea.vmem %s46_s20, 64  ;;  %p212_p11 = scmp.lt.s32.totalorder %s46_s20, %s46_s20 }
  0x18   :  { %p208_p10 = scmp.ne.s32.totalorder %s46_s20, %s207_s21  ;;  %p213_p12 = scmp.lt.s32.totalorder %s207_s21, %s207_s21 }
  0x1a   :  { %p214_p13 = por %p213_p12, %p212_p11 }
  0x1c   :  { %p215_p0 = pnand %p214_p13, %p208_p10 }
  0x1e   :  { %218 = shalt.err (!%p215_p0)
}
  0x1f   :  { %48 = dma.hbm_to_vmem [thread:$0]  %s343_s4, 64, %s46_s20, [#allocation15]  }
  0x20   :  { %219 = dma.done.wait [#allocation13], 64  }
  0x21   :  { %220 = vsyncadd [#allocation13], 4294967232 }
  0x22   :  { %221 = dma.done.wait [#allocation15], 128  }
  0x23   :  { %222 = vsyncadd [#allocation15], 4294967168  ;;  %vm74_vm0 = vcmask 3072   ;;  %v226_v0 = vmov 0.0   ;;  %v66_v1 = vld [vmem:[#allocation16] sm:$0xf] }
  0x24   :  { %77 = vst.msk [vmem:[%s347_s8] sm:$0xf] %vm74_vm0, %v226_v0  ;;  %75 = vst.msk [vmem:[%s345_s6] sm:$0xf] %vm74_vm0, %v226_v0  ;;  %v62_v2 = vld [vmem:[#allocation12] sm:$0xf] }
  0x25   :  { %76 = vst.msk [vmem:[%s346_s7] sm:$0xf] %vm74_vm0, %v226_v0  ;;  %78 = vst.msk [vmem:[%s348_s9] sm:$0xf] %vm74_vm0, %v226_v0  ;;  %v80_v3 = vld [vmem:[%s339_s0] sm:$0xf] }
  0x26   :  { %69 = vst [vmem:[#allocation18] sm:$0xf] %v66_v1  ;;  %65 = vst [vmem:[#allocation17] sm:$0xf] %v62_v2  ;;  %v81_v9 = vld [vmem:[#allocation14] sm:$0xf] }
  0x27   :  { %vm86_vm1 = vcmask 125952   ;;  %v100_v18 = vld [vmem:[%s341_s2] sm:$0xf]  ;;  %vm121_vm3 = vcmask 60416  }
  0x28   :  { %v94_v14 = vsel %vm86_vm1, %v81_v9, 0.0  ;;  %v101_v27 = vld [vmem:[%s342_s3] sm:$0xf] }
  0x29   :  { %v128_v32 = vsel %vm121_vm3, %v101_v27, 0.0 }
  0x2b   :  { %v85_v33 = vld [vmem:[%s345_s6] sm:$0xf] }
  0x2c   :  { %v93_v36 = vld [vmem:[%s346_s7] sm:$0xf] }
  0x2d   :  { %v99_v4 = vld [vmem:[#allocation18] sm:$0xf]  ;;  %v79_v6 = vld [vmem:[#allocation17] sm:$0xf]  ;;  %v120_v39 = vld [vmem:[%s347_s8] sm:$0xf] }
  0x2e   :  { %v105_v5 = vand.u32 2147483647, %v99_v4  ;;  %v82_v7 = vsub.f32 %v79_v6, %v80_v3  ;;  %v102_v20 = vmax.f32 %v99_v4, 0.0  ;;  %v103_v21 = vmul.f32 %v100_v18, %v99_v4  ;;  %v127_v42 = vld [vmem:[%s348_s9] sm:$0xf] }
  0x30   :  { %v106_v8 = vsub.f32 0.0, %v105_v5  ;;  %v83_v10 = vmul.f32 %v82_v7, %v82_v7  ;;  %v104_v25 = vsub.f32 %v102_v20, %v103_v21 }
  0x32   :  { %v107_v11 = vmul.f32 1.442695, %v106_v8  ;;  %v84_v12 = vmul.f32 %v83_v10, %v81_v9 }
  0x34   :  { %155 = vpow2.f32 %v107_v11  ;;  %v87_v13 = vsel %vm86_vm1, %v84_v12, 0.0 }
  0x35   :  { %88 = vadd.xlane.f32.xlu0 %v87_v13 }
  0x39   :  { %95 = vadd.xlane.f32.xlu0 %v94_v14 }
  0x41   :  { %v156_v15 = vpop.eup %155 }
  0x42   :  { %v109_v16 = vadd.f32 1.0, %v156_v15  ;;  %v112_v17 = vmul.f32 -0.5, %v156_v15  ;;  %v115_v22 = vand.u32 2147483647, %v156_v15 }
  0x44   :  { %157 = vlog2.f32 %v109_v16  ;;  %v113_v19 = vadd.f32 1.0, %v112_v17  ;;  %vm116_vm2 = vcmp.lt.f32.partialorder %v115_v22, 0.0004427343 }
  0x46   :  { %v114_v23 = vmul.f32 %v156_v15, %v113_v19 }
  0x51   :  { %v158_v24 = vpop.eup %157 }
  0x52   :  { %v111_v26 = vmul.f32 0.6931472, %v158_v24 }
  0x54   :  { %v117_v28 = vsel %vm116_vm2, %v114_v23, %v111_v26 }
  0x55   :  { %v118_v29 = vadd.f32 %v117_v28, %v104_v25 }
  0x57   :  { %v119_v30 = vmul.f32 %v118_v29, %v101_v27 }
  0x59   :  { %v122_v31 = vsel %vm121_vm3, %v119_v30, 0.0 }
  0x5a   :  { %123 = vadd.xlane.f32.xlu1 %v122_v31 }
  0x5e   :  { %129 = vadd.xlane.f32.xlu1 %v128_v32 }
  0xbe   :  { %v89_v34 = vpop.xlane.xlu0 %88 }
  0xbf   :  { %v90_v35 = vadd.f32 %v89_v34, %v85_v33 }
  0xc1   :  { %92 = vst.msk [vmem:[%s345_s6] sm:$0xf] %vm74_vm0, %v90_v35 }
  0xc2   :  { %v96_v37 = vpop.xlane.xlu0 %95 }
  0xc3   :  { %v97_v38 = vadd.f32 %v96_v37, %v93_v36 }
  0xc5   :  { %98 = vst.msk [vmem:[%s346_s7] sm:$0xf] %vm74_vm0, %v97_v38 }
  0xe3   :  { %v124_v40 = vpop.xlane.xlu1 %123 }
  0xe4   :  { %v125_v41 = vadd.f32 %v124_v40, %v120_v39 }
  0xe6   :  { %126 = vst.msk [vmem:[%s347_s8] sm:$0xf] %vm74_vm0, %v125_v41 }
  0xe7   :  { %v130_v43 = vpop.xlane.xlu1 %129 }
  0xe8   :  { %v131_v44 = vadd.f32 %v130_v43, %v127_v42 }
  0xea   :  { %132 = vst.msk [vmem:[%s348_s9] sm:$0xf] %vm74_vm0, %v131_v44 }
  0xeb   :  { %149 = vsyncpa [#allocation13], 1 }
  0xec   :  { %150 = vsyncpa [#allocation15], 1 }

</bundles_post_ra>
